<compile_context>
chip_gen: v6e
topology: v6e:2x2x1
jax: 0.10.0
libtpu: 0.0.40
codegen_flags: <defaults>
</compile_context>

<pallas_src>
import jax
import jax.numpy as jnp
from jax.experimental import pallas as pl
from jax.experimental.pallas import tpu as pltpu


def expert_kernel(x_ref, w_ref, b_ref, o_ref):
    """One (tm, tn) output tile; o_ref (f32) is the accumulator across K steps."""
    k = pl.program_id(2)

    @pl.when(k == 0)
    def _():
        o_ref[...] = jnp.zeros_like(o_ref)

    # x tile: (tm, tk) bf16 ; w tile: (tn, tk) bf16 (torch layout, no transpose).
    # Contract dim 1 of both -> (tm, tn), f32 accumulate on the MXU.
    o_ref[...] += jax.lax.dot_general(
        x_ref[...],
        w_ref[...],
        dimension_numbers=(((1,), (1,)), ((), ())),
        preferred_element_type=jnp.float32,
    )

    @pl.when(k == pl.num_programs(2) - 1)
    def _():
        # Bias add in f32 (broadcast (1, tn) row over the tile).
        o_ref[...] += b_ref[...]


def expert_forward(x, weight, bias, *, tm=None, tn=None, tk=None):
    """x: (M, K); weight: (N, K) as in torch nn.Linear; bias: (N,). Returns f32 (M, N)."""
    M, K = x.shape
    N, Kw = weight.shape
    assert K == Kw, "weight must be (out_features, in_features)"

    # Tile selection: collapse K when it fits, keep N split so the j axis stays
    # "parallel" with extent >= 2 (v7x megacore), tm limited by the token count.
    if tm is None:
        tm = M if M <= 256 else 256
    if tk is None:
        tk = K if K <= 2048 else 2048
    if tn is None:
        tn = min(N, 512)
    assert M % tm == 0 and N % tn == 0 and K % tk == 0, (
        "shapes must be divisible by the tile sizes"
    )

    # bf16 operands for the MXU; f32 bias / accumulation.
    x_bf = x.astype(jnp.bfloat16)
    w_bf = weight.astype(jnp.bfloat16)
    b2 = bias.astype(jnp.float32).reshape(1, N)

    grid = (M // tm, N // tn, K // tk)
    return pl.pallas_call(
        expert_kernel,
        out_shape=jax.ShapeDtypeStruct((M, N), jnp.float32),
        grid_spec=pltpu.PrefetchScalarGridSpec(
            num_scalar_prefetch=0,
            grid=grid,
            in_specs=[
                pl.BlockSpec((tm, tk), lambda i, j, k: (i, k)),   # x tile (bf16)
                pl.BlockSpec((tn, tk), lambda i, j, k: (j, k)),   # W tile, torch (N,K) layout
                pl.BlockSpec((1, tn), lambda i, j, k: (0, j)),    # bias row (f32)
            ],
            out_specs=pl.BlockSpec((tm, tn), lambda i, j, k: (i, j)),
        ),
        compiler_params=pltpu.CompilerParams(
            dimension_semantics=("parallel", "parallel", "arbitrary"),
            vmem_limit_bytes=32 * 1024 * 1024,  # safe on v7x's 64 MiB physical VMEM
        ),
    )(x_bf, w_bf, b2)


if __name__ == "__main__":
    # Module-consistent shapes: 16 tokens, in_features=512, out_features=1024.
    M, IN, OUT = 16, 512, 1024

    key = jax.random.PRNGKey(0)
    kx, kw, kb = jax.random.split(key, 3)
    x = jax.random.normal(kx, (M, IN), dtype=jnp.float32)
    # torch nn.Linear stores weight as (out_features, in_features).
    weight = jax.random.normal(kw, (OUT, IN), dtype=jnp.float32) * 0.02
    bias = jax.random.normal(kb, (OUT,), dtype=jnp.float32) * 0.02

    y = expert_forward(x, weight, bias)
    y = jax.block_until_ready(y)
    assert y.shape == (M, OUT)

    # Reference with the same numerics (bf16 inputs, f32 accumulate).
    y_ref_bf16 = jax.lax.dot_general(
        x.astype(jnp.bfloat16),
        weight.astype(jnp.bfloat16),
        dimension_numbers=(((1,), (1,)), ((), ())),
        preferred_element_type=jnp.float32,
    ) + bias
    assert jnp.allclose(y, y_ref_bf16, atol=1e-2, rtol=1e-2)

    # Sanity vs. full-f32 nn.Linear semantics (looser tolerance for bf16 operands).
    y_ref_f32 = x @ weight.T + bias
    assert jnp.allclose(y, y_ref_f32, atol=5e-2, rtol=5e-2)

    print("KERNEL_OK")
</pallas_src>

<mosaic_0001>
module attributes {stable_mosaic.version = 11 : i64} {
  func.func @expert_kernel(%arg0: i32, %arg1: i32, %arg2: i32, %arg3: memref<16x512xbf16, #tpu.memory_space<vmem>>, %arg4: memref<512x512xbf16, #tpu.memory_space<vmem>>, %arg5: memref<1x512xf32, #tpu.memory_space<vmem>>, %arg6: memref<16x512xf32, #tpu.memory_space<vmem>>) attributes {dimension_semantics = [#tpu.dimension_semantics<parallel>, #tpu.dimension_semantics<parallel>, #tpu.dimension_semantics<arbitrary>], iteration_bounds = array<i64: 1, 2, 1>, scalar_prefetch = 0 : i64, scratch_operands = 0 : i64, tpu.core_type = #tpu.core_type<tc>, window_params = [{transform_indices = @transform_0, window_bounds = array<i64: 16, 512>}, {transform_indices = @transform_1, window_bounds = array<i64: 512, 512>}, {transform_indices = @transform_2, window_bounds = array<i64: 1, 512>}, {transform_indices = @transform_3, window_bounds = array<i64: 16, 512>}]} {
    %c0_i32 = arith.constant 0 : i32
    %0 = arith.cmpi eq, %arg2, %c0_i32 : i32
    %1 = arith.extui %0 : i1 to i32
    %c0_i32_0 = arith.constant 0 : i32
    %2 = arith.cmpi ne, %1, %c0_i32_0 : i32
    scf.if %2 {
      %cst_10 = arith.constant 0.000000e+00 : f32
      %12 = vector.broadcast %cst_10 : f32 to vector<16x512xf32>
      %c0_11 = arith.constant 0 : index
      %c0_12 = arith.constant 0 : index
      %13 = vector.load %arg6[%c0_11, %c0_12] : memref<16x512xf32, #tpu.memory_space<vmem>>, vector<16x512xf32>
      tpu.vector_store %arg6[%c0_11, %c0_12], %12 {strides = array<i32>} : memref<16x512xf32, #tpu.memory_space<vmem>>, vector<16x512xf32>,
    } else {
    }
    %c0 = arith.constant 0 : index
    %c0_1 = arith.constant 0 : index
    %3 = vector.load %arg6[%c0, %c0_1] : memref<16x512xf32, #tpu.memory_space<vmem>>, vector<16x512xf32>
    %c0_2 = arith.constant 0 : index
    %c0_3 = arith.constant 0 : index
    %4 = vector.load %arg3[%c0_2, %c0_3] : memref<16x512xbf16, #tpu.memory_space<vmem>>, vector<16x512xbf16>
    %c0_4 = arith.constant 0 : index
    %c0_5 = arith.constant 0 : index
    %5 = vector.load %arg4[%c0_4, %c0_5] : memref<512x512xbf16, #tpu.memory_space<vmem>>, vector<512x512xbf16>
    %cst = arith.constant dense<0.000000e+00> : vector<16x512xf32>
    %6 = tpu.matmul %4, %5, %cst {dimension_numbers = #tpu.dot_dimension_numbers<[1], [1], [0], [0], [0, 0, 1, 0], [], []>} : vector<16x512xbf16>, vector<512x512xbf16>, vector<16x512xf32> -> vector<16x512xf32>
    %7 = arith.addf %3, %6 : vector<16x512xf32>
    %c0_6 = arith.constant 0 : index
    %c0_7 = arith.constant 0 : index
    %8 = vector.load %arg6[%c0_6, %c0_7] : memref<16x512xf32, #tpu.memory_space<vmem>>, vector<16x512xf32>
    tpu.vector_store %arg6[%c0_6, %c0_7], %7 {strides = array<i32>} : memref<16x512xf32, #tpu.memory_space<vmem>>, vector<16x512xf32>,
    %c0_i32_8 = arith.constant 0 : i32
    %9 = arith.cmpi eq, %arg2, %c0_i32_8 : i32
    %10 = arith.extui %9 : i1 to i32
    %c0_i32_9 = arith.constant 0 : i32
    %11 = arith.cmpi ne, %10, %c0_i32_9 : i32
    scf.if %11 {
      %c0_10 = arith.constant 0 : index
      %c0_11 = arith.constant 0 : index
      %12 = vector.load %arg6[%c0_10, %c0_11] : memref<16x512xf32, #tpu.memory_space<vmem>>, vector<16x512xf32>
      %c0_12 = arith.constant 0 : index
      %c0_13 = arith.constant 0 : index
      %13 = vector.load %arg5[%c0_12, %c0_13] : memref<1x512xf32, #tpu.memory_space<vmem>>, vector<1x512xf32>
      %14 = vector.broadcast %13 : vector<1x512xf32> to vector<16x512xf32>
      %15 = arith.addf %12, %14 : vector<16x512xf32>
      %c0_14 = arith.constant 0 : index
      %c0_15 = arith.constant 0 : index
      %16 = vector.load %arg6[%c0_14, %c0_15] : memref<16x512xf32, #tpu.memory_space<vmem>>, vector<16x512xf32>
      tpu.vector_store %arg6[%c0_14, %c0_15], %15 {strides = array<i32>} : memref<16x512xf32, #tpu.memory_space<vmem>>, vector<16x512xf32>,
    } else {
    }
    return
  }
  func.func @transform_0(%arg0: i32, %arg1: i32, %arg2: i32) -> (i32, i32) {
    %c0_i32 = arith.constant 0 : i32
    return %arg0, %arg2 : i32, i32
  }
  func.func @transform_1(%arg0: i32, %arg1: i32, %arg2: i32) -> (i32, i32) {
    %c0_i32 = arith.constant 0 : i32
    return %arg1, %arg2 : i32, i32
  }
  func.func @transform_2(%arg0: i32, %arg1: i32, %arg2: i32) -> (i32, i32) {
    %c0_i32 = arith.constant 0 : i32
    %c0_i32_0 = arith.constant 0 : i32
    return %c0_i32, %arg1 : i32, i32
  }
  func.func @transform_3(%arg0: i32, %arg1: i32, %arg2: i32) -> (i32, i32) {
    %c0_i32 = arith.constant 0 : i32
    return %arg0, %arg1 : i32, i32
  }
}

</mosaic_0001>

<bundles_post_ra>
// kernel: tpu_custom_call.1
= control target key start
LH: loop header
LB: loop body
LE: loop exit
PB: predicated region body
PF: predicated region fallthrough
CT: control target
= control target key end

     0   :  { %8 = vsyncpa [#allocation3], 0  ;;  %s2474_s0 = inlined_call_operand.hbm [shape: bf16[16,512], index: 0, kind: input, shape index: {}]   ;;  %s2475_s1 = inlined_call_operand.hbm [shape: bf16[1024,512], index: 1, kind: input, shape index: {}]   ;;  %s2476_s2 = inlined_call_operand.hbm [shape: f32[1,1024], index: 2, kind: input, shape index: {}]   ;;  %s2477_s3 = inlined_call_operand.hbm [shape: f32[16,1024], index: 3, kind: output, shape index: {}]  }
   0x1   :  { %9 = vsyncpa [#allocation6], 0 }
   0x2   :  { %11 = vsyncpa [#allocation6 + $0x1], 0 }
   0x3   :  { %12 = vsyncpa [#allocation4], 0 }
   0x4   :  { %14 = vsyncpa [#allocation4 + $0x1], 0  ;;  %s2115_s12 = smov 0   ;;  %s2117_s13 = smov 0  }
   0x5   :  { %s2119_s14 = smov 0   ;;  %s2121_s15 = smov 0  }
   0x6   :  { %s2123_s16 = smov 0   ;;  %s2125_s17 = smov 0  }
   0x7 LB: > { %s35_s18 = sadd.s32 1, %s2080_s16  ;;  %s76_s19 = sadd.s32 1, %s2072_s14  ;;  %s2084_s17 = sphi %s2125_s17, %s20_s17   ;;  %s2080_s16 = sphi %s2123_s16, %s2501_s16   ;;  %s2076_s15 = sphi %s2121_s15, %s2500_s15   ;;  %s2072_s14 = sphi %s2119_s14, %s2499_s14   ;;  %s2068_s13 = sphi %s2117_s13, %s2498_s13   ;;  %s2064_s12 = sphi %s2115_s12, %s2497_s12  }
   0x8   : > { %p37_p0 = scmp.ge.s32.totalorder %s35_s18, 2  ;;  %p83_p1 = scmp.ne.s32.totalorder %s2072_s14, %s2068_s13 }
   0x9   : > { %p84_p2 = scmp.eq.s32.totalorder %s2084_s17, 0  ;;  %p1662_p6 = scmp.lt.s32.totalorder %s2084_s17, 2 }
   0xa   : > { %s2503_s18 = smov (%p37_p0, %s35_s18), 0  ;;  %s186_s22 = sand.u32 1, %s2084_s17  }
   0xb   : > { %p2155_p3 = por %p84_p2, %p83_p1  ;;  %s71_s21 = ssub.s32 %s2080_s16, %s2503_s18 }
   0xc   : > { %p74_p5 = scmp.eq.s32.totalorder %s71_s21, 0  ;;  %s188_s23 = sand.u32 1, %s2072_s14  }
   0xd   : > { %s1483_s25 = sshll.u32 %s188_s23, 10  ;;  %s1633_s26 = sshll.u32 %s2080_s16, 14 }
   0xe   : > { %s2166_s24 = scalar_select %p74_p5, %s2072_s14, %s76_s19  }
   0xf   : > { %s199_s29 = scalar_lea.hbm %s2475_s1, %s1633_s26  ;;  %s190_s30 = scalar_lea.vmem [#allocation5], %s1483_s25 }
  0x10   : > { %s200_s4 = sshll.u32 %s190_s30, 4  ;;  %p2176_p7 = pnand %p1662_p6, %p2155_p3  ;;  %s201_s4 = int_to_ptr.vmem [resolvable:$true] %s200_s4 }
  0x11   : > { %s2180_s6 = scalar_lea.sflag [#allocation6], %s186_s22  ;;  %s1931_s7 = scalar_lea.vmem %s201_s4, 16384 }
  0x12   : > { %p2479_p8 = pneg %p2176_p7  ;;  %p1932_p9 = scmp.ne.s32.totalorder %s201_s4, %s1931_s7 }
  0x13   : > { %s2086_s8 = smov [#allocation5]  }
  0x14   : > { %p1934_p10 = pnand %p1932_p9, %p2479_p8  ;;  %s1936_s9 = sshll.u32 %s2086_s8, 4  ;;  %s1937_s9 = int_to_ptr.vmem [resolvable:$false] %s1936_s9 }
  0x15   : > { %s1938_s10 = scalar_lea.vmem %s1937_s9, 32768  ;;  %p1939_p12 = scmp.lt.s32.totalorder %s201_s4, %s1937_s9 }
  0x16   : > { %p1935_p11 = pneg %p1934_p10  ;;  %p1940_p13 = scmp.lt.s32.totalorder %s1938_s10, %s1931_s7 }
  0x18   : > { %p1941_p0 = por %p1940_p13, %p1939_p12 }
  0x1a   : > { %p1942_p2 = pnand %p1941_p0, %p1935_p11 }
  0x1c   : > { %1945 = shalt.err (!%p1942_p2)
}
  0x1d   : > { %s2478_s11 = smov 256   ;;  %s2088_s19 = smov 16  }
  0x1e   : > { %1653 = dma.hbm_to_vmem [thread:$0]  (!%p2176_p7), %s199_s29, 16384, %s201_s4, %s2180_s6, %s2478_s11, %s2478_s11, %s2088_s19  }
  0x1f   : > { %s2194_s20 = sadd.s32 4294967295, %s2084_s17   ;;  %s1479_s21 = sadd.s32 4294967294, %s2084_s17  }
  0x20   : > { %p89_p3 = scmp.ne.s32.totalorder %s2068_s13, %s2064_s12  ;;  %p2481_p5 = scmp.eq.s32.totalorder %s2194_s20, 0 }
  0x21   : > { %p141_p6 = scmp.eq.s32.totalorder %s2194_s20, 1  ;;  %p147_p9 = scmp.eq.s32.totalorder %s1479_s21, 1 }
  0x22   : > { %p1480_p10 = scmp.ge.s32.totalorder %s2084_s17, 1  ;;  %p2204_p11 = por %p2481_p5, %p89_p3 }
  0x23   : > { %p2211_p12 = por %p141_p6, %p83_p1  ;;  %p2215_p13 = por %p147_p9, %p89_p3 }
  0x24   : > { %s2485_s22 = scalar_select %p2204_p11, 1, 0 }
  0x25   : > { %s2486_s25 = scalar_select %p2211_p12, 1, 0 }
  0x26   : > { %s2487_s26 = scalar_select %p2215_p13, 1, 0 }
  0x27   : > { %p154_p0 = scmp.lt.s32.totalorder %s2084_s17, 3  ;;  %s2089_s28 = smov [#allocation2]  }
  0x28   : > { %s172_s29 = sshll.u32 %s2089_s28, 4  ;;  %s1487_s30 = sshll.u32 %s188_s23, 2  ;;  %s173_s29 = int_to_ptr.vmem [resolvable:$true] %s172_s29 }
  0x29   : > { %p2220_p2 = pnand %p1480_p10, %p154_p0  ;;  %s1634_s4 = sshll.u32 %s2080_s16, 6 }
  0x2a   : > { %s214_s7 = scalar_lea.vmem [#allocation7], %s1487_s30  ;;  %s220_s21 = scalar_lea.hbm %s2476_s2, %s1634_s4 }
  0x2b   : > { %p1646_p4 = pneg %p2220_p2  ;;  %s222_s8 = sshll.u32 %s214_s7, 4  ;;  %s223_s8 = int_to_ptr.vmem [resolvable:$true] %s222_s8 }
  0x2c   : > { %s1957_s11 = scalar_lea.vmem %s173_s29, 512  ;;  %p1965_p0 = scmp.lt.s32.totalorder %s173_s29, %s173_s29 }
  0x2d   : > { %p1647_p1 = pnand %p1646_p4, %p2481_p5  ;;  %p1958_p6 = scmp.ne.s32.totalorder %s173_s29, %s1957_s11 }
  0x2e   : > { %p1966_p8 = scmp.lt.s32.totalorder %s1957_s11, %s1957_s11 }
  0x2f   : > { %p1948_p3 = pneg %p1647_p1 }
  0x30   : > { %p1967_p13 = por %p1966_p8, %p1965_p0 }
  0x31   : > { %p1960_p9 = pnand %p1958_p6, %p1948_p3 }
  0x33   : > { %p1961_p10 = pneg %p1960_p9 }
  0x35   : > { %p1968_p12 = pnand %p1967_p13, %p1961_p10 }
  0x37   : > { %1971 = shalt.err (!%p1968_p12)
}
  0x38   : > { %s2489_s23 = smov 256   ;;  %s1985_s4 = scalar_lea.vmem %s223_s8, 64 }
  0x39   : > { %1649 = dma.hbm_to_vmem [thread:$0]  (!%p1647_p1), %s2474_s0, 512, %s173_s29, [#allocation3], %s2489_s23, %s2489_s23, %s2088_s19  }
  0x3a   : > { %p1986_p4 = scmp.ne.s32.totalorder %s223_s8, %s1985_s4  ;;  %p2490_p5 = pneg %p2176_p7 }
  0x3b   : > { %s2090_s7 = smov [#allocation7]  }
  0x3c   : > { %p1988_p11 = pnand %p1986_p4, %p2490_p5  ;;  %s1990_s9 = sshll.u32 %s2090_s7, 4  ;;  %s1991_s9 = int_to_ptr.vmem [resolvable:$false] %s1990_s9 }
  0x3d   : > { %s1992_s11 = scalar_lea.vmem %s1991_s9, 128  ;;  %p1993_p8 = scmp.lt.s32.totalorder %s223_s8, %s1991_s9 }
  0x3e   : > { %p1989_p3 = pneg %p1988_p11  ;;  %p1994_p12 = scmp.lt.s32.totalorder %s1992_s11, %s1985_s4 }
  0x40   : > { %p1995_p13 = por %p1994_p12, %p1993_p8 }
  0x42   : > { %p1996_p6 = pnand %p1995_p13, %p1989_p3 }
  0x44   : > { %1999 = shalt.err (!%p1996_p6)
}
  0x45   : > { %1656 = dma.hbm_to_vmem [thread:$0]  (!%p2176_p7), %s220_s21, 64, %s223_s8, %s2180_s6  }
  0x46   : > { %231 = sbr.rel (%p2220_p2) target bundleno = 556 (0x22c), region = 32  ;;  %p2491_p1 = scmp.eq.s32.totalorder (!%p2220_p2), %s2194_s20, 0 }
  0x4b   : > { %2051 = dma.done.wait (%p2491_p1), [#allocation3], 512   ;;  %p2492_p5 = pmov %p2491_p1 }
  0x4c   : > { %s237_s19 = sand.u32 1, %s2194_s20   ;;  %s2254_s29 = sand.u32 1, %s2068_s13  }
  0x4d   : > { %2053 = vsyncadd (%p2492_p5), [#allocation3], 4294966784  ;;  %s1492_s10 = sshll.u32 %s2254_s29, 10  ;;  %s238_s5 = scalar_lea.sflag [#allocation6], %s237_s19 }
  0x4e   : > { %s2257_s23 = scalar_lea.vmem [#allocation5], %s1492_s10  ;;  %p2493_p7 = scmp.ne.s32.totalorder %s2485_s22, 0 }
  0x50   : > { %2055 = dma.done.wait (%p2493_p7), %s238_s5, 16448  }
  0x51   : > { %2057 = vsyncadd (%p2493_p7), %s238_s5, 4294950848  ;;  %v1720_v0 = vld [vmem:[%s2257_s23 + $0xe4] ss:$16 sps:$4 sm:$0xff]   ;;  %v1722_v1 = vld [vmem:[%s2257_s23 + $0xec] ss:$16 sps:$4 sm:$0xff]   ;;  %s1493_s6 = sshll.u32 %s2254_s29, 2 }
  0x52   : > { %1097 = vmatprep.subr.bf16.mxu0 %v1720_v0  ;;  %v1724_v2 = vld [vmem:[%s2257_s23 + $0xe0] ss:$16 sps:$4 sm:$0xff]   ;;  %v1725_v3 = vld [vmem:[%s2257_s23 + $0xe8] ss:$16 sps:$4 sm:$0xff]   ;;  %1140 = vmatprep.subr.bf16.mxu1 %v1722_v1  ;;  %v1726_v4 = vld [vmem:[%s2257_s23 + $0xc4] ss:$16 sps:$4 sm:$0xff]  }
  0x53   : > { %1098 = vmatpush1.bf16.xpose.msra.mxu0 %v1724_v2  ;;  %1141 = vmatpush1.bf16.xpose.msra.mxu1 %v1725_v3  ;;  %v1728_v5 = vld [vmem:[%s2257_s23 + $0xcc] ss:$16 sps:$4 sm:$0xff]   ;;  %v1730_v6 = vld [vmem:[%s2257_s23 + $0xc0] ss:$16 sps:$4 sm:$0xff]   ;;  %v1731_v7 = vld [vmem:[%s2257_s23 + $0xc8] ss:$16 sps:$4 sm:$0xff]  }
  0x54   : > { %1099 = vmatprep.subr.bf16.mxu0 %v1726_v4  ;;  %1142 = vmatprep.subr.bf16.mxu1 %v1728_v5  ;;  %v1732_v8 = vld [vmem:[%s2257_s23 + $0xa4] ss:$16 sps:$4 sm:$0xff]   ;;  %v1734_v9 = vld [vmem:[%s2257_s23 + $0xac] ss:$16 sps:$4 sm:$0xff]   ;;  %v1736_v10 = vld [vmem:[%s2257_s23 + $0xa0] ss:$16 sps:$4 sm:$0xff]  }
  0x55   : > { %v1737_v11 = vld [vmem:[%s2257_s23 + $0xa8] ss:$16 sps:$4 sm:$0xff]   ;;  %v1738_v12 = vld [vmem:[%s2257_s23 + $0x84] ss:$16 sps:$4 sm:$0xff]   ;;  %v1740_v13 = vld [vmem:[%s2257_s23 + $0x8c] ss:$16 sps:$4 sm:$0xff]  }
  0x56   : > { %v1742_v14 = vld [vmem:[%s2257_s23 + $0x80] ss:$16 sps:$4 sm:$0xff]   ;;  %v1743_v15 = vld [vmem:[%s2257_s23 + $0x88] ss:$16 sps:$4 sm:$0xff]   ;;  %v1744_v16 = vld [vmem:[%s2257_s23 + $0x64] ss:$16 sps:$4 sm:$0xff]  }
  0x57   : > { %v1746_v17 = vld [vmem:[%s2257_s23 + $0x6c] ss:$16 sps:$4 sm:$0xff]   ;;  %v1748_v18 = vld [vmem:[%s2257_s23 + $0x60] ss:$16 sps:$4 sm:$0xff]   ;;  %v1749_v19 = vld [vmem:[%s2257_s23 + $0x68] ss:$16 sps:$4 sm:$0xff]  }
  0x58   : > { %v1750_v20 = vld [vmem:[%s2257_s23 + $0x44] ss:$16 sps:$4 sm:$0xff]   ;;  %v1752_v21 = vld [vmem:[%s2257_s23 + $0x4c] ss:$16 sps:$4 sm:$0xff]   ;;  %v1754_v22 = vld [vmem:[%s2257_s23 + $0x40] ss:$16 sps:$4 sm:$0xff]  }
  0x59   : > { %v1755_v23 = vld [vmem:[%s2257_s23 + $0x48] ss:$16 sps:$4 sm:$0xff]   ;;  %v1756_v24 = vld [vmem:[%s2257_s23 + $0x24] ss:$16 sps:$4 sm:$0xff]   ;;  %v1758_v25 = vld [vmem:[%s2257_s23 + $0x2c] ss:$16 sps:$4 sm:$0xff]  }
  0x5a   : > { %v2289_v26 = vld [vmem:[#allocation2 + $0x4] ss:$16 sps:$4 sm:$0xff]   ;;  %v2291_v27 = vld [vmem:[#allocation2 + $0xc] ss:$16 sps:$4 sm:$0xff]   ;;  %v1760_v28 = vld [vmem:[%s2257_s23 + $0x20] ss:$16 sps:$4 sm:$0xff]  }
  0x5b   : > { %1100 = vmatpush1.bf16.xpose.msra.mxu0 %v1730_v6  ;;  %1143 = vmatpush1.bf16.xpose.msra.mxu1 %v1731_v7  ;;  %v1761_v29 = vld [vmem:[%s2257_s23 + $0x28] ss:$16 sps:$4 sm:$0xff]   ;;  %v1762_v30 = vld [vmem:[%s2257_s23 + $0x4] ss:$16 sps:$4 sm:$0xff]   ;;  %v1764_v31 = vld [vmem:[%s2257_s23 + $0xc] ss:$16 sps:$4 sm:$0xff]  }
  0x5c   : > { %1101 = vmatprep.subr.bf16.mxu0 %v1732_v8  ;;  %1144 = vmatprep.subr.bf16.mxu1 %v1734_v9  ;;  %v1766_v32 = vld [vmem:[%s2257_s23] ss:$16 sps:$4 sm:$0xff]   ;;  %v1767_v33 = vld [vmem:[%s2257_s23 + $0x8] ss:$16 sps:$4 sm:$0xff]   ;;  %v1768_v34 = vld [vmem:[%s2257_s23 + $0x1e4] ss:$16 sps:$4 sm:$0xff]  }
  0x5d   : > { %1129 = vmatprep.mubr.bf16.mxu0 %v2289_v26  ;;  %1172 = vmatprep.mubr.bf16.mxu1 %v2291_v27  ;;  %v1770_v35 = vld [vmem:[%s2257_s23 + $0x1ec] ss:$16 sps:$4 sm:$0xff]   ;;  %v1772_v36 = vld [vmem:[%s2257_s23 + $0x1e0] ss:$16 sps:$4 sm:$0xff]   ;;  %v1773_v37 = vld [vmem:[%s2257_s23 + $0x1e8] ss:$16 sps:$4 sm:$0xff]  }
  0x5e   : > { %v1774_v38 = vld [vmem:[%s2257_s23 + $0x1c4] ss:$16 sps:$4 sm:$0xff]   ;;  %v1776_v39 = vld [vmem:[%s2257_s23 + $0x1cc] ss:$16 sps:$4 sm:$0xff]   ;;  %v1778_v40 = vld [vmem:[%s2257_s23 + $0x1c0] ss:$16 sps:$4 sm:$0xff]  }
  0x5f   : > { %v1779_v41 = vld [vmem:[%s2257_s23 + $0x1c8] ss:$16 sps:$4 sm:$0xff]   ;;  %v1780_v42 = vld [vmem:[%s2257_s23 + $0x1a4] ss:$16 sps:$4 sm:$0xff]   ;;  %v1782_v43 = vld [vmem:[%s2257_s23 + $0x1ac] ss:$16 sps:$4 sm:$0xff]  }
  0x60   : > { %v1784_v44 = vld [vmem:[%s2257_s23 + $0x1a0] ss:$16 sps:$4 sm:$0xff]   ;;  %v1785_v45 = vld [vmem:[%s2257_s23 + $0x1a8] ss:$16 sps:$4 sm:$0xff]   ;;  %v1786_v46 = vld [vmem:[%s2257_s23 + $0x184] ss:$16 sps:$4 sm:$0xff]  }
  0x61   : > { %v1788_v47 = vld [vmem:[%s2257_s23 + $0x18c] ss:$16 sps:$4 sm:$0xff]   ;;  %v1790_v48 = vld [vmem:[%s2257_s23 + $0x180] ss:$16 sps:$4 sm:$0xff]   ;;  %v1791_v49 = vld [vmem:[%s2257_s23 + $0x188] ss:$16 sps:$4 sm:$0xff]  }
  0x62   : > { %v1792_v50 = vld [vmem:[%s2257_s23 + $0x164] ss:$16 sps:$4 sm:$0xff]   ;;  %v1794_v51 = vld [vmem:[%s2257_s23 + $0x16c] ss:$16 sps:$4 sm:$0xff]   ;;  %v1796_v52 = vld [vmem:[%s2257_s23 + $0x160] ss:$16 sps:$4 sm:$0xff]  }
  0x63   : > { %1102 = vmatpush1.bf16.xpose.msra.mxu0 %v1736_v10  ;;  %1145 = vmatpush1.bf16.xpose.msra.mxu1 %v1737_v11  ;;  %v1797_v53 = vld [vmem:[%s2257_s23 + $0x168] ss:$16 sps:$4 sm:$0xff]   ;;  %v1798_v54 = vld [vmem:[%s2257_s23 + $0x144] ss:$16 sps:$4 sm:$0xff]   ;;  %v1800_v55 = vld [vmem:[%s2257_s23 + $0x14c] ss:$16 sps:$4 sm:$0xff]  }
  0x64   : > { %1103 = vmatprep.subr.bf16.mxu0 %v1738_v12  ;;  %1146 = vmatprep.subr.bf16.mxu1 %v1740_v13  ;;  %v1802_v56 = vld [vmem:[%s2257_s23 + $0x140] ss:$16 sps:$4 sm:$0xff]   ;;  %v1803_v57 = vld [vmem:[%s2257_s23 + $0x148] ss:$16 sps:$4 sm:$0xff]   ;;  %v1804_v58 = vld [vmem:[%s2257_s23 + $0x124] ss:$16 sps:$4 sm:$0xff]  }
  0x65   : > { %v1806_v59 = vld [vmem:[%s2257_s23 + $0x12c] ss:$16 sps:$4 sm:$0xff]   ;;  %v1808_v60 = vld [vmem:[%s2257_s23 + $0x120] ss:$16 sps:$4 sm:$0xff]   ;;  %v1809_v61 = vld [vmem:[%s2257_s23 + $0x128] ss:$16 sps:$4 sm:$0xff]  }
  0x66   : > { %v1810_v62 = vld [vmem:[%s2257_s23 + $0x104] ss:$16 sps:$4 sm:$0xff]   ;;  %v1812_v63 = vld [vmem:[%s2257_s23 + $0x10c] ss:$16 sps:$4 sm:$0xff]   ;;  %v1814_v0 = vld [vmem:[%s2257_s23 + $0x100] ss:$16 sps:$4 sm:$0xff]  }
  0x67   : > { %v1815_v1 = vld [vmem:[%s2257_s23 + $0x108] ss:$16 sps:$4 sm:$0xff]   ;;  %v1824_v2 = vld [vmem:[%s2257_s23 + $0x2e4] ss:$16 sps:$4 sm:$0xff]   ;;  %v1827_v3 = vld [vmem:[%s2257_s23 + $0x2ec] ss:$16 sps:$4 sm:$0xff]  }
  0x68   : > { %v2335_v4 = vld [vmem:[#allocation2] ss:$16 sps:$4 sm:$0xff]   ;;  %v2337_v5 = vld [vmem:[#allocation2 + $0x8] ss:$16 sps:$4 sm:$0xff]   ;;  %v1830_v8 = vld [vmem:[%s2257_s23 + $0x2c4] ss:$16 sps:$4 sm:$0xff]  }
  0x69   : > { %v1822_v6 = vld [vmem:[%s2257_s23 + $0x2e0] ss:$16 sps:$4 sm:$0xff]   ;;  %v1825_v7 = vld [vmem:[%s2257_s23 + $0x2e8] ss:$16 sps:$4 sm:$0xff]   ;;  %v1833_v9 = vld [vmem:[%s2257_s23 + $0x2cc] ss:$16 sps:$4 sm:$0xff]  }
  0x6a   : > { %v1828_v10 = vld [vmem:[%s2257_s23 + $0x2c0] ss:$16 sps:$4 sm:$0xff]   ;;  %v1831_v11 = vld [vmem:[%s2257_s23 + $0x2c8] ss:$16 sps:$4 sm:$0xff]   ;;  %v1836_v12 = vld [vmem:[%s2257_s23 + $0x2a4] ss:$16 sps:$4 sm:$0xff]  }
  0x6b   : > { %1104 = vmatpush1.bf16.xpose.msra.mxu0 %v1742_v14  ;;  %1147 = vmatpush1.bf16.xpose.msra.mxu1 %v1743_v15  ;;  %v1839_v13 = vld [vmem:[%s2257_s23 + $0x2ac] ss:$16 sps:$4 sm:$0xff]   ;;  %v1834_v14 = vld [vmem:[%s2257_s23 + $0x2a0] ss:$16 sps:$4 sm:$0xff]   ;;  %v1837_v15 = vld [vmem:[%s2257_s23 + $0x2a8] ss:$16 sps:$4 sm:$0xff]  }
  0x6c   : > { %1105 = vmatprep.subr.bf16.mxu0 %v1744_v16  ;;  %1148 = vmatprep.subr.bf16.mxu1 %v1746_v17  ;;  %v1842_v16 = vld [vmem:[%s2257_s23 + $0x284] ss:$16 sps:$4 sm:$0xff]   ;;  %v1845_v17 = vld [vmem:[%s2257_s23 + $0x28c] ss:$16 sps:$4 sm:$0xff]   ;;  %s250_s20 = scalar_lea.vmem [#allocation7], %s1493_s6  ;;  %s1494_s22 = sshll.u32 %s2254_s29, 6 }
  0x6d   : > { %s2409_s27 = scalar_lea.vmem [#allocation8], %s1494_s22  ;;  %s1635_s8 = sshll.u32 %s2076_s15, 9 }
  0x6e   : > { %s1351_s21 = sshll.u32 %s2409_s27, 4  ;;  %s2422_s4 = scalar_lea.hbm %s2477_s3, %s1635_s8  ;;  %s2424_s21 = int_to_ptr.vmem [resolvable:$true] %s1351_s21 }
  0x6f   : > { %s1335_s15 = scalar_lea.sflag [#allocation4], %s2254_s29  ;;  %s2000_s7 = scalar_lea.vmem %s2424_s21, 1024 }
  0x70   : > { %p2001_p11 = scmp.ne.s32.totalorder %s2424_s21, %s2000_s7  ;;  %p2494_p2 = scmp.ne.s32.totalorder %s2486_s25, 0 }
  0x71   : > { %s2091_s9 = smov [#allocation8]  }
  0x72   : > { %p2002_p9 = pnand %p2001_p11, %p2494_p2  ;;  %s2004_s11 = sshll.u32 %s2091_s9, 4  ;;  %s2005_s11 = int_to_ptr.vmem [resolvable:$false] %s2004_s11 }
  0x73   : > { %1106 = vmatpush1.bf16.xpose.msra.mxu0 %v1748_v18  ;;  %1149 = vmatpush1.bf16.xpose.msra.mxu1 %v1749_v19  ;;  %v1840_v18 = vld [vmem:[%s2257_s23 + $0x280] ss:$16 sps:$4 sm:$0xff]   ;;  %v1843_v19 = vld [vmem:[%s2257_s23 + $0x288] ss:$16 sps:$4 sm:$0xff]   ;;  %s2006_s19 = scalar_lea.vmem %s2005_s11, 2048  ;;  %p2007_p0 = scmp.lt.s32.totalorder %s2424_s21, %s2005_s11 }
  0x74   : > { %1107 = vmatprep.subr.bf16.mxu0 %v1750_v20  ;;  %1150 = vmatprep.subr.bf16.mxu1 %v1752_v21  ;;  %v1848_v20 = vld [vmem:[%s2257_s23 + $0x264] ss:$16 sps:$4 sm:$0xff]   ;;  %v1851_v21 = vld [vmem:[%s2257_s23 + $0x26c] ss:$16 sps:$4 sm:$0xff]   ;;  %p2003_p10 = pneg %p2002_p9  ;;  %p2008_p4 = scmp.lt.s32.totalorder %s2006_s19, %s2000_s7 }
  0x76   : > { %p2009_p3 = por %p2008_p4, %p2007_p0 }
  0x78   : > { %p2010_p8 = pnand %p2009_p3, %p2003_p10 }
  0x7b   : > { %1108 = vmatpush1.bf16.xpose.msra.mxu0 %v1754_v22  ;;  %1151 = vmatpush1.bf16.xpose.msra.mxu1 %v1755_v23  ;;  %v1846_v22 = vld [vmem:[%s2257_s23 + $0x260] ss:$16 sps:$4 sm:$0xff]   ;;  %v1849_v23 = vld [vmem:[%s2257_s23 + $0x268] ss:$16 sps:$4 sm:$0xff]  }
  0x7c   : > { %1109 = vmatprep.subr.bf16.mxu0 %v1756_v24  ;;  %1152 = vmatprep.subr.bf16.mxu1 %v1758_v25  ;;  %v1854_v24 = vld [vmem:[%s2257_s23 + $0x244] ss:$16 sps:$4 sm:$0xff]   ;;  %v1857_v25 = vld [vmem:[%s2257_s23 + $0x24c] ss:$16 sps:$4 sm:$0xff]  }
  0x83   : > { %1110 = vmatpush1.bf16.xpose.msra.mxu0 %v1760_v28  ;;  %1153 = vmatpush1.bf16.xpose.msra.mxu1 %v1761_v29  ;;  %v1860_v28 = vld [vmem:[%s2257_s23 + $0x224] ss:$16 sps:$4 sm:$0xff]   ;;  %v1863_v29 = vld [vmem:[%s2257_s23 + $0x22c] ss:$16 sps:$4 sm:$0xff]  }
  0x84   : > { %1111 = vmatprep.subr.bf16.mxu0 %v1762_v30  ;;  %1154 = vmatprep.subr.bf16.mxu1 %v1764_v31  ;;  %v1858_v30 = vld [vmem:[%s2257_s23 + $0x220] ss:$16 sps:$4 sm:$0xff]   ;;  %v1861_v31 = vld [vmem:[%s2257_s23 + $0x228] ss:$16 sps:$4 sm:$0xff]  }
  0x8b   : > { %1112 = vmatpush1.bf16.xpose.msra.mxu0 %v1766_v32  ;;  %1155 = vmatpush1.bf16.xpose.msra.mxu1 %v1767_v33  ;;  %v1866_v32 = vld [vmem:[%s2257_s23 + $0x204] ss:$16 sps:$4 sm:$0xff]   ;;  %v1869_v33 = vld [vmem:[%s2257_s23 + $0x20c] ss:$16 sps:$4 sm:$0xff]  }
  0x8c   : > { %1113 = vmatprep.subr.bf16.mxu0 %v1768_v34  ;;  %1156 = vmatprep.subr.bf16.mxu1 %v1770_v35  ;;  %v1864_v34 = vld [vmem:[%s2257_s23 + $0x200] ss:$16 sps:$4 sm:$0xff]   ;;  %v1867_v35 = vld [vmem:[%s2257_s23 + $0x208] ss:$16 sps:$4 sm:$0xff]  }
  0x93   : > { %1114 = vmatpush2.bf16.xpose.msra.mxu0 %v1772_v36  ;;  %1157 = vmatpush2.bf16.xpose.msra.mxu1 %v1773_v37  ;;  %v1872_v36 = vld [vmem:[%s2257_s23 + $0x3e4] ss:$16 sps:$4 sm:$0xff]   ;;  %v1875_v37 = vld [vmem:[%s2257_s23 + $0x3ec] ss:$16 sps:$4 sm:$0xff]  }
  0x94   : > { %1115 = vmatprep.subr.bf16.mxu0 %v1774_v38  ;;  %1158 = vmatprep.subr.bf16.mxu1 %v1776_v39  ;;  %v1870_v38 = vld [vmem:[%s2257_s23 + $0x3e0] ss:$16 sps:$4 sm:$0xff]   ;;  %v1873_v39 = vld [vmem:[%s2257_s23 + $0x3e8] ss:$16 sps:$4 sm:$0xff]  }
  0x9b   : > { %1116 = vmatpush2.bf16.xpose.msra.mxu0 %v1778_v40  ;;  %1159 = vmatpush2.bf16.xpose.msra.mxu1 %v1779_v41  ;;  %v1878_v40 = vld [vmem:[%s2257_s23 + $0x3c4] ss:$16 sps:$4 sm:$0xff]   ;;  %v1881_v41 = vld [vmem:[%s2257_s23 + $0x3cc] ss:$16 sps:$4 sm:$0xff]  }
  0x9c   : > { %1117 = vmatprep.subr.bf16.mxu0 %v1780_v42  ;;  %1160 = vmatprep.subr.bf16.mxu1 %v1782_v43  ;;  %v1876_v42 = vld [vmem:[%s2257_s23 + $0x3c0] ss:$16 sps:$4 sm:$0xff]   ;;  %v1879_v43 = vld [vmem:[%s2257_s23 + $0x3c8] ss:$16 sps:$4 sm:$0xff]  }
  0xa3   : > { %1118 = vmatpush2.bf16.xpose.msra.mxu0 %v1784_v44  ;;  %1161 = vmatpush2.bf16.xpose.msra.mxu1 %v1785_v45  ;;  %v1884_v44 = vld [vmem:[%s2257_s23 + $0x3a4] ss:$16 sps:$4 sm:$0xff]   ;;  %v1887_v45 = vld [vmem:[%s2257_s23 + $0x3ac] ss:$16 sps:$4 sm:$0xff]  }
  0xa4   : > { %1119 = vmatprep.subr.bf16.mxu0 %v1786_v46  ;;  %1162 = vmatprep.subr.bf16.mxu1 %v1788_v47  ;;  %v1882_v46 = vld [vmem:[%s2257_s23 + $0x3a0] ss:$16 sps:$4 sm:$0xff]   ;;  %v1885_v47 = vld [vmem:[%s2257_s23 + $0x3a8] ss:$16 sps:$4 sm:$0xff]  }
  0xab   : > { %1120 = vmatpush2.bf16.xpose.msra.mxu0 %v1790_v48  ;;  %1163 = vmatpush2.bf16.xpose.msra.mxu1 %v1791_v49  ;;  %v1890_v48 = vld [vmem:[%s2257_s23 + $0x384] ss:$16 sps:$4 sm:$0xff]   ;;  %v1893_v49 = vld [vmem:[%s2257_s23 + $0x38c] ss:$16 sps:$4 sm:$0xff]  }
  0xac   : > { %1121 = vmatprep.subr.bf16.mxu0 %v1792_v50  ;;  %1164 = vmatprep.subr.bf16.mxu1 %v1794_v51  ;;  %v1888_v50 = vld [vmem:[%s2257_s23 + $0x380] ss:$16 sps:$4 sm:$0xff]   ;;  %v1891_v51 = vld [vmem:[%s2257_s23 + $0x388] ss:$16 sps:$4 sm:$0xff]  }
  0xb3   : > { %1122 = vmatpush2.bf16.xpose.msra.mxu0 %v1796_v52  ;;  %1165 = vmatpush2.bf16.xpose.msra.mxu1 %v1797_v53  ;;  %v1896_v52 = vld [vmem:[%s2257_s23 + $0x364] ss:$16 sps:$4 sm:$0xff]   ;;  %v1899_v53 = vld [vmem:[%s2257_s23 + $0x36c] ss:$16 sps:$4 sm:$0xff]  }
  0xb4   : > { %1123 = vmatprep.subr.bf16.mxu0 %v1798_v54  ;;  %1166 = vmatprep.subr.bf16.mxu1 %v1800_v55  ;;  %v1894_v54 = vld [vmem:[%s2257_s23 + $0x360] ss:$16 sps:$4 sm:$0xff]   ;;  %v1897_v55 = vld [vmem:[%s2257_s23 + $0x368] ss:$16 sps:$4 sm:$0xff]  }
  0xbb   : > { %1124 = vmatpush2.bf16.xpose.msra.mxu0 %v1802_v56  ;;  %1167 = vmatpush2.bf16.xpose.msra.mxu1 %v1803_v57  ;;  %v1902_v56 = vld [vmem:[%s2257_s23 + $0x344] ss:$16 sps:$4 sm:$0xff]   ;;  %v1905_v57 = vld [vmem:[%s2257_s23 + $0x34c] ss:$16 sps:$4 sm:$0xff]  }
  0xbc   : > { %1125 = vmatprep.subr.bf16.mxu0 %v1804_v58  ;;  %1168 = vmatprep.subr.bf16.mxu1 %v1806_v59  ;;  %v1900_v58 = vld [vmem:[%s2257_s23 + $0x340] ss:$16 sps:$4 sm:$0xff]   ;;  %v1903_v59 = vld [vmem:[%s2257_s23 + $0x348] ss:$16 sps:$4 sm:$0xff]  }
  0xc3   : > { %1126 = vmatpush2.bf16.xpose.msra.mxu0 %v1808_v60  ;;  %1169 = vmatpush2.bf16.xpose.msra.mxu1 %v1809_v61  ;;  %v1908_v60 = vld [vmem:[%s2257_s23 + $0x324] ss:$16 sps:$4 sm:$0xff]   ;;  %v1911_v61 = vld [vmem:[%s2257_s23 + $0x32c] ss:$16 sps:$4 sm:$0xff]  }
  0xc4   : > { %1127 = vmatprep.subr.bf16.mxu0 %v1810_v62  ;;  %1170 = vmatprep.subr.bf16.mxu1 %v1812_v63  ;;  %v1906_v62 = vld [vmem:[%s2257_s23 + $0x320] ss:$16 sps:$4 sm:$0xff]   ;;  %v1909_v63 = vld [vmem:[%s2257_s23 + $0x328] ss:$16 sps:$4 sm:$0xff]  }
  0xcb   : > { %1128 = vmatpush2.bf16.xpose.msra.mxu0 %v1814_v0  ;;  %1171 = vmatpush2.bf16.xpose.msra.mxu1 %v1815_v1  ;;  %v1914_v0 = vld [vmem:[%s2257_s23 + $0x304] ss:$16 sps:$4 sm:$0xff]   ;;  %v1917_v1 = vld [vmem:[%s2257_s23 + $0x30c] ss:$16 sps:$4 sm:$0xff]  }
  0xcc   : > { %1183 = vmatprep.subr.bf16.mxu0 %v1824_v2  ;;  %1226 = vmatprep.subr.bf16.mxu1 %v1827_v3  ;;  %v1912_v2 = vld [vmem:[%s2257_s23 + $0x300] ss:$16 sps:$4 sm:$0xff]   ;;  %v1915_v3 = vld [vmem:[%s2257_s23 + $0x308] ss:$16 sps:$4 sm:$0xff]  }
  0xd2   : > { %1130 = vmatmul.mubr.bf16.vlgmr.msra.gmra.mxu0 %v2335_v4  ;;  %1173 = vmatmul.mubr.bf16.vlgmr.msra.gmra.mxu1 %v2337_v5 }
  0xd3   : > { %1184 = vmatpush1.bf16.xpose.msra.mxu0 %v1822_v6  ;;  %1227 = vmatpush1.bf16.xpose.msra.mxu1 %v1825_v7  ;;  %v1298_v6 = vlaneseq }
  0xd4   : > { %1185 = vmatprep.subr.bf16.mxu0 %v1830_v8  ;;  %1228 = vmatprep.subr.bf16.mxu1 %v1833_v9  ;;  %v1296_v9 = vld [vmem:[%s250_s20] sm:$0xf] }
  0xd5   : > { %1215 = vmatprep.mubr.bf16.mxu0 %v2289_v26  ;;  %1258 = vmatprep.mubr.bf16.mxu1 %v2291_v27  ;;  %v1852_v26 = vld [vmem:[%s2257_s23 + $0x240] ss:$16 sps:$4 sm:$0xff]   ;;  %v1855_v27 = vld [vmem:[%s2257_s23 + $0x248] ss:$16 sps:$4 sm:$0xff]   ;;  %v1299_v7 = vshrl.u32 %v1298_v6, 7 }
  0xd7   : > { %v1300_v8 = vsub.s32 0, %v1299_v7 }
  0xdb   : > { %1186 = vmatpush1.bf16.xpose.msra.mxu0 %v1828_v10  ;;  %1229 = vmatpush1.bf16.xpose.msra.mxu1 %v1831_v11  ;;  %v1304_v10 = vsub.s32 1, %v1299_v7 }
  0xdc   : > { %1187 = vmatprep.subr.bf16.mxu0 %v1836_v12  ;;  %1230 = vmatprep.subr.bf16.mxu1 %v1839_v13 }
  0xe3   : > { %1188 = vmatpush1.bf16.xpose.msra.mxu0 %v1834_v14  ;;  %1231 = vmatpush1.bf16.xpose.msra.mxu1 %v1837_v15  ;;  %v1301_v14 = vrot.slane %v1296_v9, %v1300_v8 }
  0xe4   : > { %1189 = vmatprep.subr.bf16.mxu0 %v1842_v16  ;;  %1232 = vmatprep.subr.bf16.mxu1 %v1845_v17 }
  0xeb   : > { %1190 = vmatpush1.bf16.xpose.msra.mxu0 %v1840_v18  ;;  %1233 = vmatpush1.bf16.xpose.msra.mxu1 %v1843_v19  ;;  %v1305_v18 = vrot.slane %v1296_v9, %v1304_v10 }
  0xec   : > { %1191 = vmatprep.subr.bf16.mxu0 %v1848_v20  ;;  %1234 = vmatprep.subr.bf16.mxu1 %v1851_v21 }
  0xf3   : > { %1192 = vmatpush1.bf16.xpose.msra.mxu0 %v1846_v22  ;;  %1235 = vmatpush1.bf16.xpose.msra.mxu1 %v1849_v23 }
  0xf4   : > { %1193 = vmatprep.subr.bf16.mxu0 %v1854_v24  ;;  %1236 = vmatprep.subr.bf16.mxu1 %v1857_v25 }
  0xfb   : > { %1194 = vmatpush1.bf16.xpose.msra.mxu0 %v1852_v26  ;;  %1237 = vmatpush1.bf16.xpose.msra.mxu1 %v1855_v27  ;;  %v1308_v27 = vsub.s32 2, %v1299_v7 }
  0xfc   : > { %1195 = vmatprep.subr.bf16.mxu0 %v1860_v28  ;;  %1238 = vmatprep.subr.bf16.mxu1 %v1863_v29  ;;  %v1312_v28 = vsub.s32 3, %v1299_v7 }
 0x103   : > { %1196 = vmatpush1.bf16.xpose.msra.mxu0 %v1858_v30  ;;  %1239 = vmatpush1.bf16.xpose.msra.mxu1 %v1861_v31 }
 0x104   : > { %1197 = vmatprep.subr.bf16.mxu0 %v1866_v32  ;;  %1240 = vmatprep.subr.bf16.mxu1 %v1869_v33  ;;  %v1309_v32 = vrot.slane %v1296_v9, %v1308_v27 }
 0x10b   : > { %1198 = vmatpush1.bf16.xpose.msra.mxu0 %v1864_v34  ;;  %1241 = vmatpush1.bf16.xpose.msra.mxu1 %v1867_v35 }
 0x10c   : > { %1199 = vmatprep.subr.bf16.mxu0 %v1872_v36  ;;  %1242 = vmatprep.subr.bf16.mxu1 %v1875_v37  ;;  %v1313_v36 = vrot.slane %v1296_v9, %v1312_v28 }
 0x113   : > { %1200 = vmatpush2.bf16.xpose.msra.mxu0 %v1870_v38  ;;  %1243 = vmatpush2.bf16.xpose.msra.mxu1 %v1873_v39 }
 0x114   : > { %1201 = vmatprep.subr.bf16.mxu0 %v1878_v40  ;;  %1244 = vmatprep.subr.bf16.mxu1 %v1881_v41 }
 0x11b   : > { %1202 = vmatpush2.bf16.xpose.msra.mxu0 %v1876_v42  ;;  %1245 = vmatpush2.bf16.xpose.msra.mxu1 %v1879_v43 }
 0x11c   : > { %1203 = vmatprep.subr.bf16.mxu0 %v1884_v44  ;;  %1246 = vmatprep.subr.bf16.mxu1 %v1887_v45 }
 0x123   : > { %1204 = vmatpush2.bf16.xpose.msra.mxu0 %v1882_v46  ;;  %1247 = vmatpush2.bf16.xpose.msra.mxu1 %v1885_v47 }
 0x124   : > { %1205 = vmatprep.subr.bf16.mxu0 %v1890_v48  ;;  %1248 = vmatprep.subr.bf16.mxu1 %v1893_v49 }
 0x12b   : > { %1206 = vmatpush2.bf16.xpose.msra.mxu0 %v1888_v50  ;;  %1249 = vmatpush2.bf16.xpose.msra.mxu1 %v1891_v51 }
 0x12c   : > { %1207 = vmatprep.subr.bf16.mxu0 %v1896_v52  ;;  %1250 = vmatprep.subr.bf16.mxu1 %v1899_v53 }
 0x133   : > { %1208 = vmatpush2.bf16.xpose.msra.mxu0 %v1894_v54  ;;  %1251 = vmatpush2.bf16.xpose.msra.mxu1 %v1897_v55 }
 0x134   : > { %1209 = vmatprep.subr.bf16.mxu0 %v1902_v56  ;;  %1252 = vmatprep.subr.bf16.mxu1 %v1905_v57 }
 0x13b   : > { %1210 = vmatpush2.bf16.xpose.msra.mxu0 %v1900_v58  ;;  %1253 = vmatpush2.bf16.xpose.msra.mxu1 %v1903_v59 }
 0x13c   : > { %1211 = vmatprep.subr.bf16.mxu0 %v1908_v60  ;;  %1254 = vmatprep.subr.bf16.mxu1 %v1911_v61 }
 0x143   : > { %1212 = vmatpush2.bf16.xpose.msra.mxu0 %v1906_v62  ;;  %1255 = vmatpush2.bf16.xpose.msra.mxu1 %v1909_v63 }
 0x144   : > { %1213 = vmatprep.subr.bf16.mxu0 %v1914_v0  ;;  %1256 = vmatprep.subr.bf16.mxu1 %v1917_v1 }
 0x14b   : > { %1214 = vmatpush2.bf16.xpose.msra.mxu0 %v1912_v2  ;;  %1257 = vmatpush2.bf16.xpose.msra.mxu1 %v1915_v3 }
 0x152   : > { %1216 = vmatmul.mubr.bf16.vlgmr.msra.gmra.mxu0 %v2335_v4  ;;  %1259 = vmatmul.mubr.bf16.vlgmr.msra.gmra.mxu1 %v2337_v5 }
 0x192   : > { %v1131_v11 = vpop.f32.mrf.mxu0  ;;  %v1174_v12 = vpop.f32.mrf.mxu1 }
 0x193   : > { %v1175_v13 = vadd.f32 %v1174_v12, %v1131_v11 }
 0x194   : > { %v1133_v15 = vpop.f32.mrf.mxu0  ;;  %v1176_v16 = vpop.f32.mrf.mxu1 }
 0x195   : > { %v1177_v17 = vadd.f32 %v1176_v16, %v1133_v15  ;;  %v1318_v20 = vadd.f32 %v1301_v14, %v1175_v13 }
 0x196   : > { %v1135_v19 = vpop.f32.mrf.mxu0  ;;  %v1178_v4 = vpop.f32.mrf.mxu1 }
 0x197   : > { %v1179_v5 = vadd.f32 %v1178_v4, %v1135_v19  ;;  %1326 = vst [vmem:[%s2409_s27] sm:$0xff] %v1318_v20  ;;  %v1319_v23 = vadd.f32 %v1305_v18, %v1177_v17 }
 0x198   : > { %v1137_v21 = vpop.f32.mrf.mxu0  ;;  %v1180_v22 = vpop.f32.mrf.mxu1 }
 0x199   : > { %v1181_v24 = vadd.f32 %v1180_v22, %v1137_v21  ;;  %1327 = vst [vmem:[%s2409_s27 + $0x8] sm:$0xff] %v1319_v23  ;;  %v1322_v25 = vadd.f32 %v1301_v14, %v1179_v5 }
 0x19b   : > { %1330 = vst [vmem:[%s2409_s27 + $0x20] sm:$0xff] %v1322_v25  ;;  %v1323_v26 = vadd.f32 %v1305_v18, %v1181_v24 }
 0x19d   : > { %1331 = vst [vmem:[%s2409_s27 + $0x28] sm:$0xff] %v1323_v26 }
 0x212   : > { %v1217_v29 = vpop.f32.mrf.mxu0  ;;  %v1260_v30 = vpop.f32.mrf.mxu1 }
 0x213   : > { %v1261_v31 = vadd.f32 %v1260_v30, %v1217_v29 }
 0x214   : > { %v1219_v33 = vpop.f32.mrf.mxu0  ;;  %v1262_v34 = vpop.f32.mrf.mxu1 }
 0x215   : > { %v1263_v35 = vadd.f32 %v1262_v34, %v1219_v33  ;;  %v1320_v39 = vadd.f32 %v1309_v32, %v1261_v31 }
 0x216   : > { %v1221_v37 = vpop.f32.mrf.mxu0  ;;  %v1264_v38 = vpop.f32.mrf.mxu1 }
 0x217   : > { %v1265_v40 = vadd.f32 %v1264_v38, %v1221_v37  ;;  %1328 = vst [vmem:[%s2409_s27 + $0x10] sm:$0xff] %v1320_v39  ;;  %v1321_v43 = vadd.f32 %v1313_v36, %v1263_v35 }
 0x218   : > { %v1223_v41 = vpop.f32.mrf.mxu0  ;;  %v1266_v42 = vpop.f32.mrf.mxu1 }
 0x219   : > { %v1267_v44 = vadd.f32 %v1266_v42, %v1223_v41  ;;  %1329 = vst [vmem:[%s2409_s27 + $0x18] sm:$0xff] %v1321_v43  ;;  %v1324_v45 = vadd.f32 %v1309_v32, %v1265_v40 }
 0x21b   : > { %1332 = vst [vmem:[%s2409_s27 + $0x30] sm:$0xff] %v1324_v45  ;;  %v1325_v46 = vadd.f32 %v1313_v36, %v1267_v44 }
 0x21d   : > { %1333 = vst [vmem:[%s2409_s27 + $0x38] sm:$0xff] %v1325_v46 }
 0x21e   : > { %2013 = shalt.err (!%p2010_p8)
}
 0x21f   : > { %s2014_s10 = scalar_lea.hbm %s2422_s4, 1024  ;;  %s2018_s6 = scalar_lea.hbm %s2477_s3, 2048 }
 0x220   : > { %p2015_p12 = scmp.ne.s32.totalorder %s2422_s4, %s2014_s10  ;;  %p2019_p1 = scmp.lt.s32.totalorder %s2422_s4, %s2477_s3 }
 0x221   : > { %p2020_p5 = scmp.lt.s32.totalorder %s2018_s6, %s2014_s10 }
 0x222   : > { %p2016_p13 = pnand %p2015_p12, %p2494_p2 }
 0x223   : > { %p2021_p7 = por %p2020_p5, %p2019_p1 }
 0x224   : > { %p2017_p6 = pneg %p2016_p13 }
 0x226   : > { %p2022_p11 = pnand %p2021_p7, %p2017_p6 }
 0x228   : > { %2025 = shalt.err (!%p2022_p11)
}
 0x229   : > { %s2092_s27 = smov 512   ;;  %s2093_s8 = smov 1024  }
 0x22a   : > { %s2094_s28 = smov 32  }
 0x22b   : > { %1644 = dma.vmem_to_hbm [thread:$0]  (%p2494_p2), %s2424_s21, 1024, %s2422_s4, %s1335_s15, %s2092_s27, %s2093_s8, %s2094_s28  }
 0x22c PF: > { %s1366_s30 = sand.u32 1, %s2064_s12   ;;  %p2495_p9 = scmp.ne.s32.totalorder %s2487_s26, 0 }
 0x22d   : > { %p2496_p10 = scmp.ge.s32.totalorder %s2084_s17, 2  ;;  %s1367_s7 = scalar_lea.sflag [#allocation4], %s1366_s30 }
 0x22f   : > { %p1658_p0 = pnand %p2496_p10, %p2495_p9 }
 0x231   : > { %p1659_p4 = pneg %p1658_p0 }
 0x233   : > { %2059 = dma.done.wait (%p1659_p4), %s1367_s7, 1024  }
 0x234   : > { %2061 = vsyncadd (%p1659_p4), %s1367_s7, 4294966272  ;;  %s20_s17 = sadd.s32 1, %s2084_s17   ;;  %s2497_s12 = smov %s2068_s13 }
 0x235   : > { %p17_p3 = scmp.ge.s32.totalorder %s20_s17, 4   ;;  %s2498_s13 = smov %s2072_s14 }
 0x236   : > { %s2499_s14 = smov %s2166_s24  ;;  %s2500_s15 = smov %s2080_s16 }
 0x237   : > { %s2501_s16 = smov %s2503_s18  ;;  %19 = sbr.rel (!%p17_p3) target bundleno = 7 (0x7), region = 102 }
 0x23c   :  { %1372 = vsyncpa [#allocation3], 1 }
 0x23d   :  { %1374 = vsyncpa [#allocation3 + $0x1], 1 }
 0x23e   :  { %1375 = vsyncpa [#allocation6], 1 }
 0x23f   :  { %1377 = vsyncpa [#allocation6 + $0x1], 1 }
 0x240   :  { %1378 = vsyncpa [#allocation4], 1 }
 0x241   :  { %1380 = vsyncpa [#allocation4 + $0x1], 1 }

</bundles_post_ra>
